<compile_context>
chip_gen: v5e
topology: v5e:2x2
jax: 0.10.0
libtpu: 0.0.40
codegen_flags: <defaults>
</compile_context>

<pallas_src>
import math

import jax
import jax.numpy as jnp
from jax.experimental import pallas as pl
from jax.experimental.pallas import tpu as pltpu

OUT_LANES = 128  # lane-dense output width (scalar Q broadcast across lanes)


def critic_kernel(s_ref, a_ref, w1s_ref, w1a_ref, b1_ref, w2_ref, b2_ref,
                  w3_ref, b3_ref, out_ref):
    """Fused 3-layer critic MLP for one batch tile.

    h1 = relu(state @ W1_s + action @ W1_a + b1)   # concat fused via split W1
    h2 = relu(h1 @ W2 + b2)
    q  = sum(h2 * w3_row, axis=-1) + b3            # VPU/XLU reduce, not N=1 MXU
    out_ref: (TB, 128) lane-dense, q broadcast across lanes.
    """
    h1 = jnp.dot(s_ref[...], w1s_ref[...], preferred_element_type=jnp.float32)
    h1 = h1 + jnp.dot(a_ref[...], w1a_ref[...], preferred_element_type=jnp.float32)
    h1 = jnp.maximum(h1 + b1_ref[...], 0.0)                           # (TB, H)

    h2 = jnp.dot(h1, w2_ref[...], preferred_element_type=jnp.float32) + b2_ref[...]
    h2 = jnp.maximum(h2, 0.0)                                         # (TB, H)

    # Final Linear(H, 1) as multiply-reduce (w3_ref is the row vector (1, H)).
    q = jnp.sum(h2 * w3_ref[...], axis=-1, keepdims=True) + b3_ref[...]   # (TB, 1)
    out_ref[...] = jnp.broadcast_to(q, out_ref.shape).astype(out_ref.dtype)


def critic_forward(state, action, params, *, batch_tile=128):
    """Wrapper: batch-tiled fused Pallas MLP kernel. Returns (B, 1)."""
    w1s, w1a, b1, w2, b2, w3, b3 = params
    B, S = state.shape
    A = action.shape[1]
    H = w2.shape[0]

    # Batch tile: whole batch if small, else 128-row tiles (multiple of 8 sublanes).
    TB = B if B <= batch_tile else batch_tile
    grid = (pl.cdiv(B, TB),)

    # Weights/biases: full-array blocks, constant index_map -> resident in VMEM.
    resident = lambda arr: pl.BlockSpec(arr.shape, lambda i: (0,) * arr.ndim)

    # VMEM budget derived from tile sizes (double-buffered streams + resident
    # weights + intermediate headroom); stays well under v7x's 64 MiB.
    stream_bytes = 2 * (TB * S + TB * A + TB * OUT_LANES) * 4
    weight_bytes = ((S + A) * H + H * H + 3 * H + 1) * 4
    interm_bytes = 4 * TB * H * 4
    vmem_limit = min(int(1.5 * (stream_bytes + weight_bytes + interm_bytes)) + (4 << 20),
                     64 << 20)

    flops = 2 * B * ((S + A) * H + H * H + H)
    bytes_accessed = (B * (S + A) + B * OUT_LANES) * 4 + weight_bytes

    out_padded = pl.pallas_call(
        critic_kernel,
        out_shape=jax.ShapeDtypeStruct((B, OUT_LANES), jnp.float32),
        grid=grid,
        in_specs=[
            pl.BlockSpec((TB, S), lambda i: (i, 0)),     # state tile (streams)
            pl.BlockSpec((TB, A), lambda i: (i, 0)),     # action tile (streams)
            resident(w1s), resident(w1a), resident(b1),
            resident(w2), resident(b2),
            resident(w3), resident(b3),
        ],
        out_specs=pl.BlockSpec((TB, OUT_LANES), lambda i: (i, 0)),
        compiler_params=pltpu.CompilerParams(
            dimension_semantics=("parallel",),           # megacore on v7x
            vmem_limit_bytes=vmem_limit,
        ),
        cost_estimate=pl.CostEstimate(
            flops=flops, transcendentals=0, bytes_accessed=bytes_accessed),
    )(state, action, w1s, w1a, b1, w2, b2, w3, b3)

    return out_padded[:, :1]                             # (B, 1)


def init_critic_params(key, state_dim, action_dim, hidden_dim):
    """Deterministic init mimicking torch.nn.Linear defaults, stored pre-split
    and pre-transposed for the kernel:
      W1_s (S,H), W1_a (A,H), b1 (1,H), W2 (H,H), b2 (1,H), w3 (1,H), b3 (1,1)
    """
    dims = [(state_dim + action_dim, hidden_dim),
            (hidden_dim, hidden_dim),
            (hidden_dim, 1)]
    raw = []
    for i, (fan_in, fan_out) in enumerate(dims):
        kw, kb = jax.random.split(jax.random.fold_in(key, i))
        bound = 1.0 / math.sqrt(fan_in)
        w = jax.random.uniform(kw, (fan_in, fan_out), jnp.float32, -bound, bound)
        b = jax.random.uniform(kb, (1, fan_out), jnp.float32, -bound, bound)
        raw += [w, b]
    w1, b1, w2, b2, w3, b3 = raw
    w1s, w1a = w1[:state_dim, :], w1[state_dim:, :]      # split W1 (fuse concat)
    w3_row = w3.T                                        # (1, H) row vector
    return (w1s, w1a, b1, w2, b2, w3_row, b3)            # b3 is (1, 1)


def critic_reference(state, action, params):
    """Pure-JAX reference (matches the PyTorch forward)."""
    w1s, w1a, b1, w2, b2, w3, b3 = params
    x = jnp.concatenate([state, action], axis=1)
    w1 = jnp.concatenate([w1s, w1a], axis=0)
    h1 = jnp.maximum(x @ w1 + b1, 0.0)
    h2 = jnp.maximum(h1 @ w2 + b2, 0.0)
    return h2 @ w3.T + b3


if __name__ == "__main__":
    # Small, forward-consistent shapes.
    batch, state_dim, action_dim, hidden_dim = 8, 16, 4, 32

    key = jax.random.PRNGKey(0)
    k_state, k_action, k_params = jax.random.split(key, 3)

    state = jax.random.normal(k_state, (batch, state_dim), jnp.float32)
    action = jax.random.normal(k_action, (batch, action_dim), jnp.float32)
    params = init_critic_params(k_params, state_dim, action_dim, hidden_dim)

    out = critic_forward(state, action, params)
    out = jax.block_until_ready(out)

    ref = critic_reference(state, action, params)
    assert out.shape == (batch, 1), out.shape
    assert jnp.allclose(out, ref, atol=1e-5, rtol=1e-5), (out, ref)

    print("KERNEL_OK")
</pallas_src>

<mosaic_0001>
module attributes {stable_mosaic.version = 11 : i64} {
  func.func @critic_kernel(%arg0: i32, %arg1: memref<8x16xf32, #tpu.memory_space<vmem>>, %arg2: memref<8x4xf32, #tpu.memory_space<vmem>>, %arg3: memref<16x32xf32, #tpu.memory_space<vmem>>, %arg4: memref<4x32xf32, #tpu.memory_space<vmem>>, %arg5: memref<1x32xf32, #tpu.memory_space<vmem>>, %arg6: memref<32x32xf32, #tpu.memory_space<vmem>>, %arg7: memref<1x32xf32, #tpu.memory_space<vmem>>, %arg8: memref<1x32xf32, #tpu.memory_space<vmem>>, %arg9: memref<1x1xf32, #tpu.memory_space<vmem>>, %arg10: memref<8x128xf32, #tpu.memory_space<vmem>>) attributes {dimension_semantics = [#tpu.dimension_semantics<parallel>], iteration_bounds = array<i64: 1>, scalar_prefetch = 0 : i64, scratch_operands = 0 : i64, tpu.core_type = #tpu.core_type<tc>, window_params = [{transform_indices = @transform_0, window_bounds = array<i64: 8, 16>}, {transform_indices = @transform_1, window_bounds = array<i64: 8, 4>}, {pipeline_mode = #tpu.pipeline_mode<synchronous>, transform_indices = @transform_2, window_bounds = array<i64: 16, 32>}, {pipeline_mode = #tpu.pipeline_mode<synchronous>, transform_indices = @transform_3, window_bounds = array<i64: 4, 32>}, {pipeline_mode = #tpu.pipeline_mode<synchronous>, transform_indices = @transform_4, window_bounds = array<i64: 1, 32>}, {pipeline_mode = #tpu.pipeline_mode<synchronous>, transform_indices = @transform_5, window_bounds = array<i64: 32, 32>}, {pipeline_mode = #tpu.pipeline_mode<synchronous>, transform_indices = @transform_6, window_bounds = array<i64: 1, 32>}, {pipeline_mode = #tpu.pipeline_mode<synchronous>, transform_indices = @transform_7, window_bounds = array<i64: 1, 32>}, {pipeline_mode = #tpu.pipeline_mode<synchronous>, transform_indices = @transform_8, window_bounds = array<i64: 1, 1>}, {transform_indices = @transform_9, window_bounds = array<i64: 8, 128>}]} {
    %c0 = arith.constant 0 : index
    %c0_0 = arith.constant 0 : index
    %0 = vector.load %arg1[%c0, %c0_0] : memref<8x16xf32, #tpu.memory_space<vmem>>, vector<8x16xf32>
    %c0_1 = arith.constant 0 : index
    %c0_2 = arith.constant 0 : index
    %1 = vector.load %arg3[%c0_1, %c0_2] : memref<16x32xf32, #tpu.memory_space<vmem>>, vector<16x32xf32>
    %cst = arith.constant dense<0.000000e+00> : vector<8x32xf32>
    %2 = tpu.matmul %0, %1, %cst {dimension_numbers = #tpu.dot_dimension_numbers<[1], [0], [0], [1], [0, 0, 1, 1], [], []>} : vector<8x16xf32>, vector<16x32xf32>, vector<8x32xf32> -> vector<8x32xf32>
    %c0_3 = arith.constant 0 : index
    %c0_4 = arith.constant 0 : index
    %3 = vector.load %arg2[%c0_3, %c0_4] : memref<8x4xf32, #tpu.memory_space<vmem>>, vector<8x4xf32>
    %c0_5 = arith.constant 0 : index
    %c0_6 = arith.constant 0 : index
    %4 = vector.load %arg4[%c0_5, %c0_6] : memref<4x32xf32, #tpu.memory_space<vmem>>, vector<4x32xf32>
    %cst_7 = arith.constant dense<0.000000e+00> : vector<8x32xf32>
    %5 = tpu.matmul %3, %4, %cst_7 {dimension_numbers = #tpu.dot_dimension_numbers<[1], [0], [0], [1], [0, 0, 1, 1], [], []>} : vector<8x4xf32>, vector<4x32xf32>, vector<8x32xf32> -> vector<8x32xf32>
    %6 = arith.addf %2, %5 : vector<8x32xf32>
    %c0_8 = arith.constant 0 : index
    %c0_9 = arith.constant 0 : index
    %7 = vector.load %arg5[%c0_8, %c0_9] : memref<1x32xf32, #tpu.memory_space<vmem>>, vector<1x32xf32>
    %8 = vector.broadcast %7 : vector<1x32xf32> to vector<8x32xf32>
    %9 = arith.addf %6, %8 : vector<8x32xf32>
    %cst_10 = arith.constant 0.000000e+00 : f32
    %10 = vector.broadcast %cst_10 : f32 to vector<8x32xf32>
    %11 = arith.maximumf %9, %10 : vector<8x32xf32>
    %c0_11 = arith.constant 0 : index
    %c0_12 = arith.constant 0 : index
    %12 = vector.load %arg6[%c0_11, %c0_12] : memref<32x32xf32, #tpu.memory_space<vmem>>, vector<32x32xf32>
    %cst_13 = arith.constant dense<0.000000e+00> : vector<8x32xf32>
    %13 = tpu.matmul %11, %12, %cst_13 {dimension_numbers = #tpu.dot_dimension_numbers<[1], [0], [0], [1], [0, 0, 1, 1], [], []>} : vector<8x32xf32>, vector<32x32xf32>, vector<8x32xf32> -> vector<8x32xf32>
    %c0_14 = arith.constant 0 : index
    %c0_15 = arith.constant 0 : index
    %14 = vector.load %arg7[%c0_14, %c0_15] : memref<1x32xf32, #tpu.memory_space<vmem>>, vector<1x32xf32>
    %15 = vector.broadcast %14 : vector<1x32xf32> to vector<8x32xf32>
    %16 = arith.addf %13, %15 : vector<8x32xf32>
    %cst_16 = arith.constant 0.000000e+00 : f32
    %17 = vector.broadcast %cst_16 : f32 to vector<8x32xf32>
    %18 = arith.maximumf %16, %17 : vector<8x32xf32>
    %c0_17 = arith.constant 0 : index
    %c0_18 = arith.constant 0 : index
    %19 = vector.load %arg8[%c0_17, %c0_18] : memref<1x32xf32, #tpu.memory_space<vmem>>, vector<1x32xf32>
    %20 = vector.broadcast %19 : vector<1x32xf32> to vector<8x32xf32>
    %21 = arith.mulf %18, %20 : vector<8x32xf32>
    %cst_19 = arith.constant dense<0.000000e+00> : vector<8xf32>
    %22 = vector.multi_reduction <add>, %21, %cst_19 [1] : vector<8x32xf32> to vector<8xf32>
    %23 = vector.shape_cast %22 : vector<8xf32> to vector<8x1xf32>
    %c0_20 = arith.constant 0 : index
    %c0_21 = arith.constant 0 : index
    %24 = vector.load %arg9[%c0_20, %c0_21] : memref<1x1xf32, #tpu.memory_space<vmem>>, vector<1x1xf32>
    %25 = vector.broadcast %24 : vector<1x1xf32> to vector<8x1xf32>
    %26 = arith.addf %23, %25 : vector<8x1xf32>
    %27 = vector.shape_cast %26 : vector<8x1xf32> to vector<8x1xf32>
    %28 = vector.broadcast %27 : vector<8x1xf32> to vector<8x128xf32>
    %c0_22 = arith.constant 0 : index
    %c0_23 = arith.constant 0 : index
    %29 = vector.load %arg10[%c0_22, %c0_23] : memref<8x128xf32, #tpu.memory_space<vmem>>, vector<8x128xf32>
    tpu.vector_store %arg10[%c0_22, %c0_23], %28 {strides = array<i32>} : memref<8x128xf32, #tpu.memory_space<vmem>>, vector<8x128xf32>,
    return
  }
  func.func @transform_0(%arg0: i32) -> (i32, i32) {
    %c0_i32 = arith.constant 0 : i32
    %c0_i32_0 = arith.constant 0 : i32
    return %arg0, %c0_i32 : i32, i32
  }
  func.func @transform_1(%arg0: i32) -> (i32, i32) {
    %c0_i32 = arith.constant 0 : i32
    %c0_i32_0 = arith.constant 0 : i32
    return %arg0, %c0_i32 : i32, i32
  }
  func.func @transform_2(%arg0: i32) -> (i32, i32) {
    %c0_i32 = arith.constant 0 : i32
    %c0_i32_0 = arith.constant 0 : i32
    %c0_i32_1 = arith.constant 0 : i32
    return %c0_i32, %c0_i32_0 : i32, i32
  }
  func.func @transform_3(%arg0: i32) -> (i32, i32) {
    %c0_i32 = arith.constant 0 : i32
    %c0_i32_0 = arith.constant 0 : i32
    %c0_i32_1 = arith.constant 0 : i32
    return %c0_i32, %c0_i32_0 : i32, i32
  }
  func.func @transform_4(%arg0: i32) -> (i32, i32) {
    %c0_i32 = arith.constant 0 : i32
    %c0_i32_0 = arith.constant 0 : i32
    %c0_i32_1 = arith.constant 0 : i32
    return %c0_i32, %c0_i32_0 : i32, i32
  }
  func.func @transform_5(%arg0: i32) -> (i32, i32) {
    %c0_i32 = arith.constant 0 : i32
    %c0_i32_0 = arith.constant 0 : i32
    %c0_i32_1 = arith.constant 0 : i32
    return %c0_i32, %c0_i32_0 : i32, i32
  }
  func.func @transform_6(%arg0: i32) -> (i32, i32) {
    %c0_i32 = arith.constant 0 : i32
    %c0_i32_0 = arith.constant 0 : i32
    %c0_i32_1 = arith.constant 0 : i32
    return %c0_i32, %c0_i32_0 : i32, i32
  }
  func.func @transform_7(%arg0: i32) -> (i32, i32) {
    %c0_i32 = arith.constant 0 : i32
    %c0_i32_0 = arith.constant 0 : i32
    %c0_i32_1 = arith.constant 0 : i32
    return %c0_i32, %c0_i32_0 : i32, i32
  }
  func.func @transform_8(%arg0: i32) -> (i32, i32) {
    %c0_i32 = arith.constant 0 : i32
    %c0_i32_0 = arith.constant 0 : i32
    %c0_i32_1 = arith.constant 0 : i32
    return %c0_i32, %c0_i32_0 : i32, i32
  }
  func.func @transform_9(%arg0: i32) -> (i32, i32) {
    %c0_i32 = arith.constant 0 : i32
    %c0_i32_0 = arith.constant 0 : i32
    return %arg0, %c0_i32 : i32, i32
  }
}

</mosaic_0001>

<bundles_post_ra>
// kernel: tpu_custom_call.1
= control target key start
LH: loop header
LB: loop body
LE: loop exit
PB: predicated region body
PF: predicated region fallthrough
CT: control target
= control target key end

     0   :  { %s379_s0 = inlined_call_operand.vmem [shape: f32[8,16], index: 0, kind: input, shape index: {}]   ;;  %s380_s1 = inlined_call_operand.vmem [shape: f32[8,4], index: 1, kind: input, shape index: {}]   ;;  %s381_s2 = inlined_call_operand.hbm [shape: f32[16,32], index: 2, kind: input, shape index: {}]   ;;  %s382_s3 = inlined_call_operand.vmem [shape: f32[4,32], index: 3, kind: input, shape index: {}]   ;;  %s383_s4 = inlined_call_operand.vmem [shape: f32[1,32], index: 4, kind: input, shape index: {}]   ;;  %s384_s5 = inlined_call_operand.hbm [shape: f32[32,32], index: 5, kind: input, shape index: {}]   ;;  %s385_s6 = inlined_call_operand.vmem [shape: f32[1,32], index: 6, kind: input, shape index: {}]   ;;  %s386_s7 = inlined_call_operand.vmem [shape: f32[1,32], index: 7, kind: input, shape index: {}]   ;;  %s387_s8 = inlined_call_operand.<no memory space> [shape: f32[1,1], index: 8, kind: input, shape index: {}]   ;;  %s388_s9 = inlined_call_operand.hbm [shape: f32[8,128], index: 9, kind: output, shape index: {}]  }
   0x1   :  { %v14_v0 = vstv %s387_s8 }
   0x2   :  { %15 = vst [vmem:[#allocation2] sm:$0x1] %v14_v0 }
   0x3   :  { %16 = vsyncpa [#allocation4], 0 }
   0x4   :  { %17 = vsyncpa [#allocation7], 0 }
   0x5   :  { %18 = vsyncpa [#allocation5], 0  ;;  %s27_s13 = sshll.u32 %s381_s2, 4  ;;  %s293_s14 = smov [#allocation3]   ;;  %s28_s13 = int_to_ptr.hbm [resolvable:$true] %s27_s13 }
   0x6   :  { %s29_s15 = sshll.u32 %s293_s14, 4  ;;  %s44_s18 = sshll.u32 %s384_s5, 4  ;;  %s30_s15 = int_to_ptr.vmem [resolvable:$true] %s29_s15  ;;  %s45_s18 = int_to_ptr.hbm [resolvable:$true] %s44_s18 }
   0x7   :  { %s294_s19 = smov 128   ;;  %s295_s20 = smov 8  }
   0x8   :  { %35 = dma.hbm_to_vmem [thread:$0]  %s28_s13, 256, %s30_s15, [#allocation4], %s294_s19, %s294_s19, %s295_s20  }
   0x9   :  { %s296_s8 = smov [#allocation6]  }
   0xa   :  { %s46_s21 = sshll.u32 %s296_s8, 4  ;;  %s47_s21 = int_to_ptr.vmem [resolvable:$true] %s46_s21 }
   0xb   :  { %52 = dma.hbm_to_vmem [thread:$0]  %s45_s18, 512, %s47_s21, [#allocation7], %s294_s19, %s294_s19, %s295_s20  }
   0xc   :  { %287 = dma.done.wait [#allocation4], 256  }
   0xd   :  { %288 = vsyncadd [#allocation4], 4294967040 }
   0xe   :  { %289 = dma.done.wait [#allocation7], 512  }
   0xf   :  { %290 = vsyncadd [#allocation7], 4294966784  ;;  %vm76_vm0 = vcmask 1043456   ;;  %vm72_vm1 = vcmask 31744   ;;  %v69_v1 = vld [vmem:[#allocation3 + $0x8] sm:$0xff]  ;;  %v68_v3 = vld [vmem:[#allocation3] sm:$0xff] }
  0x10   :  { %v71_v2 = vld [vmem:[%s382_s3] sm:$0xf]  ;;  %118 = vmatpush.msra.mxu1 %v69_v1  ;;  %vm100_vm2 = vcmask 130048   ;;  %v133_v6 = vld [vmem:[#allocation6 + $0x18] sm:$0xff]  ;;  %v130_v9 = vld [vmem:[#allocation6] sm:$0xff]  ;;  %vm138_vm3 = vcmask 261120  }
  0x11   :  { %200 = vmatpush.msk.msra.mxu0 %vm76_vm0, %v71_v2  ;;  %v70_v4 = vld [vmem:[%s380_s1] sm:$0xff]  ;;  %154 = vmatpush.msra.mxu2 %v133_v6  ;;  %v297_v23 = vmov 0   ;;  %s189_s10 = sshll.u32 %s388_s9, 4  ;;  %s190_s10 = int_to_ptr.hbm [resolvable:$true] %s189_s10 }
  0x12   :  { %v67_v5 = vld [vmem:[%s379_s0] sm:$0xff]  ;;  %201 = vmatmul.msk.f32.vlgmr.msra.gmra.mxu0 %vm72_vm1, %v70_v4  ;;  %119 = vmatpush.msra.mxu1 %v68_v3 }
  0x13   :  { %202 = vmatmul.msk.f32.vlgmr.msra.gmra.mxu1 %vm100_vm2, %v67_v5  ;;  %v132_v7 = vld [vmem:[#allocation6 + $0x10] sm:$0xff]  ;;  %v131_v8 = vld [vmem:[#allocation6 + $0x8] sm:$0xff]  ;;  %210 = vset.pattern.permute.xlu0 %v297_v23 }
  0x14   :  { %155 = vmatpush.msra.mxu2 %v132_v7  ;;  %v211_v11 = vld [vmem:[%s383_s4] ss:$0 sm:$0xff]  ;;  %s298_s4 = smov [#allocation8]  }
  0x15   :  { %v212_v16 = vld [vmem:[%s385_s6] ss:$0 sm:$0xff]  ;;  %s187_s29 = sshll.u32 %s298_s4, 4  ;;  %s188_s29 = int_to_ptr.vmem [resolvable:$true] %s187_s29 }
  0x16   :  { %156 = vmatpush.msra.mxu2 %v131_v8  ;;  %v213_v19 = vld [vmem:[%s386_s7] ss:$0 sm:$0xff] }
  0x17   :  { %v214_v24 = vld [vmem:[#allocation2] ss:$0 sm:$0xff] }
  0x18   :  { %157 = vmatpush.msra.mxu2 %v130_v9 }
  0x8f   :  { %v97_v10 = vpop.f32.mrf.mxu0 }
  0x90   :  { %v121_v12 = vpop.f32.mrf.mxu1 }
  0x91   :  { %v122_v13 = vadd.f32 %v121_v12, %v97_v10 }
  0x93   :  { %v128_v14 = vadd.f32 %v211_v11, %v122_v13 }
  0x95   :  { %v129_v15 = vmax.f32 %v128_v14, 0.0 }
  0x97   :  { %203 = vmatmul.msk.f32.vlgmr.msra.gmra.mxu2 %vm138_vm3, %v129_v15 }
 0x11a   :  { %v159_v17 = vpop.f32.mrf.mxu2 }
 0x11b   :  { %v160_v18 = vadd.f32 %v212_v16, %v159_v17 }
 0x11d   :  { %v162_v20 = vmax.f32 %v160_v18, 0.0 }
 0x11f   :  { %v167_v21 = vmul.f32 %v213_v19, %v162_v20 }
 0x121   :  { %v168_v22 = vsel %vm138_vm3, %v167_v21, 0.0 }
 0x122   :  { %169 = vadd.xlane.f32.xlu0 %v168_v22 }
 0x195   :  { %v170_v25 = vpop.xlane.xlu0 %169 }
 0x196   :  { %v175_v26 = vadd.f32 %v214_v24, %v170_v25 }
 0x198   :  { %178 = vperm.xlu0 %210, %v175_v26  }
 0x20a   :  { %v179_v27 = vpop.permute.xlu0 %178 }
 0x20b   :  { %181 = vst [vmem:[#allocation8] sm:$0xff] %v179_v27 }
 0x20c   :  { %192 = dma.vmem_to_hbm [thread:$0]  %s188_s29, 128, %s190_s10, [#allocation5]  }
 0x20d   :  { %291 = dma.done.wait [#allocation5], 128  }
 0x20e   :  { %292 = vsyncadd [#allocation5], 4294967168 }
 0x20f   :  { %197 = vsyncpa [#allocation4], 1 }
 0x210   :  { %198 = vsyncpa [#allocation7], 1 }
 0x211   :  { %199 = vsyncpa [#allocation5], 1 }

</bundles_post_ra>
